<compile_context>
chip_gen: v7x
topology: tpu7x:2x2x1
jax: 0.10.0
libtpu: 0.0.40
codegen_flags: <defaults>
</compile_context>

<pallas_src>
import functools
import math

import jax
import jax.numpy as jnp
from jax import lax
from jax.experimental import pallas as pl
from jax.experimental.pallas import tpu as pltpu

_INV_SQRT2 = 1.0 / math.sqrt(2.0)
_LN_EPS = 1e-5  # nn.LayerNorm default eps (config["eps"] is the manifold eps).


def _cdiv(a: int, b: int) -> int:
    return -(-a // b)


def _round_up(x: int, m: int) -> int:
    return _cdiv(x, m) * m


def _sublane_pack(dtype) -> int:
    """Rows per packed sublane group: f32 -> 8, bf16 -> 16, int8/fp8 -> 32."""
    return max(8, (4 // jnp.dtype(dtype).itemsize) * 8)


def _wubu_level_kernel(x_ref, w_ref, p_ref, o_ref, acc_ref, *, eps: float):
    """acc += x @ W over the K grid axis; GELU + LayerNorm epilogue on the last step."""
    k = pl.program_id(1)

    @pl.when(k == 0)
    def _():
        acc_ref[...] = jnp.zeros_like(acc_ref)

    # MXU matmul in the operands' native dtype (bf16 stays bf16), f32 accumulation.
    acc_ref[...] += jnp.dot(x_ref[...], w_ref[...],
                            preferred_element_type=jnp.float32)

    @pl.when(k == pl.num_programs(1) - 1)
    def _():
        params = p_ref[...].astype(jnp.float32)          # (8, d_out): rows 0..2 used
        bias, gamma, beta = params[0:1, :], params[1:2, :], params[2:3, :]

        h = acc_ref[...] + bias                          # (tm, d_out), f32
        # Exact GELU (PyTorch nn.GELU default, approximate='none').
        # TODO(synk): tanh-approx GELU would move the transcendental onto the EUP
        # slot but changes numerics vs PyTorch, so it is intentionally not used.
        g = 0.5 * h * (1.0 + lax.erf(h * _INV_SQRT2))

        mean = jnp.mean(g, axis=-1, keepdims=True)
        centered = g - mean
        var = jnp.mean(centered * centered, axis=-1, keepdims=True)
        y = centered * lax.rsqrt(var + eps)
        o_ref[...] = (y * gamma + beta).astype(o_ref.dtype)


def wubu_level_transform(x, w, params, *, tile_m: int = 1024, ln_eps: float = _LN_EPS,
                         vmem_budget_frac: float = 0.75):
    """x: (N, D_in), w: (D_in, D_out), params: (8, D_out) rows = [bias, gamma, beta].

    Returns LayerNorm(GELU(x @ w + bias)) with shape (N, D_out) in x.dtype.
    """
    n, d_in = x.shape
    d_in_w, d_out = w.shape
    assert d_in_w == d_in and params.shape == (8, d_out)

    x_item = jnp.dtype(x.dtype).itemsize
    w_item = jnp.dtype(w.dtype).itemsize
    p_item = jnp.dtype(params.dtype).itemsize
    o_item = x_item

    # -- VMEM-aware tiling (re-derived per chip: 64 MiB on v7x, 128 MiB v5e/v6e). --
    try:
        vmem_cap = int(getattr(pltpu.get_tpu_info(), "vmem_capacity_bytes",
                               64 * 1024 * 1024))
    except Exception:
        vmem_cap = 64 * 1024 * 1024
    budget = int(vmem_cap * vmem_budget_frac)

    # K (d_in) tiling so W never has to live whole in VMEM at large layer sizes.
    w_budget = budget // 2
    if d_in % 128 != 0 or 2 * d_in * d_out * w_item <= w_budget:
        tk = d_in
    else:
        tk = max(128, (w_budget // (2 * d_out * w_item)) // 128 * 128)
        tk = min(tk, d_in)
        while d_in % tk != 0:          # d_in % 128 == 0 here, so this terminates
            tk -= 128
    k_tiles = _cdiv(d_in, tk)

    # Row tile: big enough to amortize the ~0.35us/step overhead, small enough to fit
    # VMEM (double-buffered x/out + f32 accumulator), and clamped so the "parallel"
    # row axis has >= 2 steps (keeps both v7x TensorCores busy; free on v5e/v6e).
    sub = _sublane_pack(x.dtype)
    fixed = 2 * tk * d_out * w_item + 2 * 8 * d_out * p_item
    per_row = 2 * tk * x_item + 2 * d_out * o_item + 4 * d_out
    tm_budget = max(sub, (budget - fixed) // per_row // sub * sub)
    tm = max(sub, min(_round_up(tile_m, sub), tm_budget,
                      _round_up(n, sub), _round_up(_cdiv(n, 2), sub)))
    grid = (_cdiv(n, tm), k_tiles)  # ragged row tail -> masked boundary blocks

    est_vmem = fixed + tm * per_row + (1 << 20)
    vmem_limit = int(min(vmem_cap, max(2 * est_vmem, 32 * 1024 * 1024)))

    kernel = functools.partial(_wubu_level_kernel, eps=ln_eps)

    def build(single_buffer_invariants: bool):
        def spec(shape, index_map, invariant):
            if single_buffer_invariants and invariant:
                # Grid-invariant operand: the second pipeline buffer is pure waste.
                return pl.BlockSpec(shape, index_map, pipeline_mode=pl.Buffered(1))
            return pl.BlockSpec(shape, index_map)

        return pl.pallas_call(
            kernel,
            out_shape=jax.ShapeDtypeStruct((n, d_out), x.dtype),
            grid_spec=pltpu.PrefetchScalarGridSpec(
                num_scalar_prefetch=0,
                grid=grid,
                in_specs=[
                    spec((tm, tk), lambda i, k: (i, k), False),            # x tile
                    spec((tk, d_out), lambda i, k: (k, 0), k_tiles == 1),  # W tile
                    spec((8, d_out), lambda i, k: (0, 0), True),           # b/gamma/beta
                ],
                out_specs=pl.BlockSpec((tm, d_out), lambda i, k: (i, 0)),
                scratch_shapes=[pltpu.VMEM((tm, d_out), jnp.float32)],
            ),
            compiler_params=pltpu.CompilerParams(
                dimension_semantics=("parallel", "arbitrary"),
                vmem_limit_bytes=vmem_limit),
        )

    try:
        return build(True)(x, w, params)
    except Exception:
        # Fallback for Pallas versions that reject pipeline_mode=pl.Buffered(1).
        return build(False)(x, w, params)


class HyperbolicWuBuNestingLevelPallas:
    """JAX/Pallas port of HyperbolicWuBuNestingLevel (forward only)."""

    def __init__(self, level_idx, input_dim, config, key, *,
                 param_dtype=jnp.float32, tile_m=1024):
        self.level_idx = level_idx
        self.input_dim = input_dim
        self.hyperbolic_dim_level = int(config["hyperbolic_dims"][level_idx])
        self.tile_m = tile_m
        d_in, d_out = input_dim, self.hyperbolic_dim_level

        # init_weights_general: xavier_uniform, gain = calculate_gain('relu') * factor
        gain = math.sqrt(2.0) * float(config.get("init_std_factor", 0.02))
        bound = gain * math.sqrt(6.0 / (d_in + d_out))
        # Master f32 copies; stored (D_in, D_out) so the kernel does x @ W
        # (torch stores (out, in)).
        self.w = jax.random.uniform(key, (d_in, d_out), minval=-bound, maxval=bound,
                                    dtype=jnp.float32)
        self.b = jnp.zeros((d_out,), jnp.float32)       # Linear bias -> zeros
        self.gamma = jnp.ones((d_out,), jnp.float32)    # LayerNorm weight -> ones
        self.beta = jnp.zeros((d_out,), jnp.float32)    # LayerNorm bias -> zeros

        # Kernel-feed copies in the activation dtype (bf16 stays bf16 on the MXU);
        # bias/gamma/beta packed into one (8, d_out) slab -> one DMA instead of three.
        self.w_k = self.w.astype(param_dtype)
        packed = jnp.zeros((8, d_out), jnp.float32)
        packed = packed.at[0].set(self.b).at[1].set(self.gamma).at[2].set(self.beta)
        self.params_k = packed.astype(param_dtype)

        self.curvature = jnp.asarray(float(config["initial_curvatures"][level_idx]),
                                     jnp.float32)
        # TODO(synk): the PyTorch module also constructs self.ball (PoincareBall), but
        # it is unused in forward, so no manifold ops are lowered here.

    def forward(self, input_tangent_p, input_origin_p):
        orig_shape = input_tangent_p.shape
        x2d = input_tangent_p.reshape(-1, orig_shape[-1])
        # TODO(synk): for sub-vreg workloads, fuse multiple WuBu levels into a single
        # kernel (or fall back to plain XLA below a size threshold) instead of one
        # pallas_call per level.
        y2d = wubu_level_transform(x2d, self.w_k, self.params_k, tile_m=self.tile_m)
        level_features_tangent = y2d.reshape(*orig_shape[:-1],
                                             self.hyperbolic_dim_level)
        return input_origin_p, level_features_tangent, self.curvature


if __name__ == "__main__":
    key = jax.random.PRNGKey(0)
    k_w, k_x, k_o = jax.random.split(key, 3)

    B, S, D_IN, D_HYP = 2, 8, 32, 32
    config = {
        "hyperbolic_dims": [D_HYP],
        "initial_curvatures": [1.0],
        "learnable_curvatures": True,
        "use_layer_norm": True,
        "activation_fn": "GELU",
        "init_std_factor": 0.02,
        "eps": 1e-7,  # PoincareBall eps (unused in forward); LayerNorm uses 1e-5.
    }

    level = HyperbolicWuBuNestingLevelPallas(0, D_IN, config, k_w)

    input_tangent_p = jax.random.normal(k_x, (B, S, D_IN), jnp.float32)
    input_origin_p = jax.random.normal(k_o, (B, S, D_IN), jnp.float32)

    origin_out, feats, curv = level.forward(input_tangent_p, input_origin_p)
    jax.block_until_ready(feats)

    # Shapes / dtypes and pass-through semantics.
    assert feats.shape == (B, S, D_HYP) and feats.dtype == input_tangent_p.dtype
    assert origin_out.shape == input_origin_p.shape
    assert curv.shape == ()

    # Reference check against plain JAX (exact GELU, LN eps=1e-5).
    ref = input_tangent_p.reshape(-1, D_IN) @ level.w + level.b
    ref = jax.nn.gelu(ref, approximate=False)
    mu = ref.mean(-1, keepdims=True)
    var = ((ref - mu) ** 2).mean(-1, keepdims=True)
    ref = ((ref - mu) / jnp.sqrt(var + _LN_EPS)) * level.gamma + level.beta
    ref = ref.reshape(B, S, D_HYP)
    assert jnp.allclose(feats, ref, atol=2e-5, rtol=2e-5), (
        float(jnp.max(jnp.abs(feats - ref))))

    # bf16 smoke test: parameters stored in bf16 -> native bf16 MXU matmul path.
    level_bf16 = HyperbolicWuBuNestingLevelPallas(0, D_IN, config, k_w,
                                                  param_dtype=jnp.bfloat16)
    _, feats_bf16, _ = level_bf16.forward(input_tangent_p.astype(jnp.bfloat16),
                                          input_origin_p.astype(jnp.bfloat16))
    jax.block_until_ready(feats_bf16)
    assert feats_bf16.shape == (B, S, D_HYP) and feats_bf16.dtype == jnp.bfloat16
    assert bool(jnp.all(jnp.isfinite(feats_bf16.astype(jnp.float32))))

    print("KERNEL_OK")
</pallas_src>

<mosaic_0001>
module attributes {stable_mosaic.version = 11 : i64} {
  func.func @_wubu_level_kernel(%arg0: i32, %arg1: i32, %arg2: memref<8x32xf32, #tpu.memory_space<vmem>>, %arg3: memref<32x32xf32, #tpu.memory_space<vmem>>, %arg4: memref<8x32xf32, #tpu.memory_space<vmem>>, %arg5: memref<8x32xf32, #tpu.memory_space<vmem>>, %arg6: memref<8x32xf32, #tpu.memory_space<vmem>>) attributes {dimension_semantics = [#tpu.dimension_semantics<parallel>, #tpu.dimension_semantics<arbitrary>], iteration_bounds = array<i64: 2, 1>, scalar_prefetch = 0 : i64, scratch_operands = 1 : i64, tpu.core_type = #tpu.core_type<tc>, window_params = [{transform_indices = @transform_0, window_bounds = array<i64: 8, 32>}, {pipeline_mode = #tpu.pipeline_mode<synchronous>, transform_indices = @transform_1, window_bounds = array<i64: 32, 32>}, {pipeline_mode = #tpu.pipeline_mode<synchronous>, transform_indices = @transform_2, window_bounds = array<i64: 8, 32>}, {transform_indices = @transform_3, window_bounds = array<i64: 8, 32>}]} {
    %c0_i32 = arith.constant 0 : i32
    %0 = arith.cmpi eq, %arg1, %c0_i32 : i32
    %1 = arith.extui %0 : i1 to i32
    %c0_i32_0 = arith.constant 0 : i32
    %2 = arith.cmpi ne, %1, %c0_i32_0 : i32
    scf.if %2 {
      %cst_10 = arith.constant 0.000000e+00 : f32
      %12 = vector.broadcast %cst_10 : f32 to vector<8x32xf32>
      %c0_11 = arith.constant 0 : index
      %c0_12 = arith.constant 0 : index
      %13 = vector.load %arg6[%c0_11, %c0_12] : memref<8x32xf32, #tpu.memory_space<vmem>>, vector<8x32xf32>
      tpu.vector_store %arg6[%c0_11, %c0_12], %12 {strides = array<i32>} : memref<8x32xf32, #tpu.memory_space<vmem>>, vector<8x32xf32>,
    } else {
    }
    %c0 = arith.constant 0 : index
    %c0_1 = arith.constant 0 : index
    %3 = vector.load %arg6[%c0, %c0_1] : memref<8x32xf32, #tpu.memory_space<vmem>>, vector<8x32xf32>
    %c0_2 = arith.constant 0 : index
    %c0_3 = arith.constant 0 : index
    %4 = vector.load %arg2[%c0_2, %c0_3] : memref<8x32xf32, #tpu.memory_space<vmem>>, vector<8x32xf32>
    %c0_4 = arith.constant 0 : index
    %c0_5 = arith.constant 0 : index
    %5 = vector.load %arg3[%c0_4, %c0_5] : memref<32x32xf32, #tpu.memory_space<vmem>>, vector<32x32xf32>
    %cst = arith.constant dense<0.000000e+00> : vector<8x32xf32>
    %6 = tpu.matmul %4, %5, %cst {dimension_numbers = #tpu.dot_dimension_numbers<[1], [0], [0], [1], [0, 0, 1, 1], [], []>} : vector<8x32xf32>, vector<32x32xf32>, vector<8x32xf32> -> vector<8x32xf32>
    %7 = arith.addf %3, %6 : vector<8x32xf32>
    %c0_6 = arith.constant 0 : index
    %c0_7 = arith.constant 0 : index
    %8 = vector.load %arg6[%c0_6, %c0_7] : memref<8x32xf32, #tpu.memory_space<vmem>>, vector<8x32xf32>
    tpu.vector_store %arg6[%c0_6, %c0_7], %7 {strides = array<i32>} : memref<8x32xf32, #tpu.memory_space<vmem>>, vector<8x32xf32>,
    %c0_i32_8 = arith.constant 0 : i32
    %9 = arith.cmpi eq, %arg1, %c0_i32_8 : i32
    %10 = arith.extui %9 : i1 to i32
    %c0_i32_9 = arith.constant 0 : i32
    %11 = arith.cmpi ne, %10, %c0_i32_9 : i32
    scf.if %11 {
      %c0_10 = arith.constant 0 : index
      %c0_11 = arith.constant 0 : index
      %12 = vector.load %arg4[%c0_10, %c0_11] : memref<8x32xf32, #tpu.memory_space<vmem>>, vector<8x32xf32>
      %13 = vector.extract_strided_slice %12 {offsets = [0, 0], sizes = [1, 32], strides = [1, 1]} : vector<8x32xf32> to vector<1x32xf32>
      %14 = vector.extract_strided_slice %12 {offsets = [1, 0], sizes = [1, 32], strides = [1, 1]} : vector<8x32xf32> to vector<1x32xf32>
      %15 = vector.extract_strided_slice %12 {offsets = [2, 0], sizes = [1, 32], strides = [1, 1]} : vector<8x32xf32> to vector<1x32xf32>
      %c0_12 = arith.constant 0 : index
      %c0_13 = arith.constant 0 : index
      %16 = vector.load %arg6[%c0_12, %c0_13] : memref<8x32xf32, #tpu.memory_space<vmem>>, vector<8x32xf32>
      %17 = vector.broadcast %13 : vector<1x32xf32> to vector<8x32xf32>
      %18 = arith.addf %16, %17 : vector<8x32xf32>
      %cst_14 = arith.constant 5.000000e-01 : f32
      %19 = vector.broadcast %cst_14 : f32 to vector<8x32xf32>
      %20 = arith.mulf %19, %18 : vector<8x32xf32>
      %cst_15 = arith.constant 0.707106769 : f32
      %21 = vector.broadcast %cst_15 : f32 to vector<8x32xf32>
      %22 = arith.mulf %18, %21 : vector<8x32xf32>
      %23 = math.erf %22 : vector<8x32xf32>
      %cst_16 = arith.constant 1.000000e+00 : f32
      %24 = vector.broadcast %cst_16 : f32 to vector<8x32xf32>
      %25 = arith.addf %24, %23 : vector<8x32xf32>
      %26 = arith.mulf %20, %25 : vector<8x32xf32>
      %cst_17 = arith.constant dense<0.000000e+00> : vector<8xf32>
      %27 = vector.multi_reduction <add>, %26, %cst_17 [1] : vector<8x32xf32> to vector<8xf32>
      %28 = vector.shape_cast %27 : vector<8xf32> to vector<8x1xf32>
      %cst_18 = arith.constant 3.200000e+01 : f32
      %29 = vector.broadcast %cst_18 : f32 to vector<8x1xf32>
      %30 = arith.divf %28, %29 : vector<8x1xf32>
      %31 = vector.broadcast %30 : vector<8x1xf32> to vector<8x32xf32>
      %32 = arith.subf %26, %31 : vector<8x32xf32>
      %33 = arith.mulf %32, %32 : vector<8x32xf32>
      %cst_19 = arith.constant dense<0.000000e+00> : vector<8xf32>
      %34 = vector.multi_reduction <add>, %33, %cst_19 [1] : vector<8x32xf32> to vector<8xf32>
      %35 = vector.shape_cast %34 : vector<8xf32> to vector<8x1xf32>
      %cst_20 = arith.constant 3.200000e+01 : f32
      %36 = vector.broadcast %cst_20 : f32 to vector<8x1xf32>
      %37 = arith.divf %35, %36 : vector<8x1xf32>
      %cst_21 = arith.constant 9.99999974E-6 : f32
      %38 = vector.broadcast %cst_21 : f32 to vector<8x1xf32>
      %39 = arith.addf %37, %38 : vector<8x1xf32>
      %40 = math.rsqrt %39 : vector<8x1xf32>
      %41 = vector.broadcast %40 : vector<8x1xf32> to vector<8x32xf32>
      %42 = arith.mulf %32, %41 : vector<8x32xf32>
      %43 = vector.broadcast %14 : vector<1x32xf32> to vector<8x32xf32>
      %44 = arith.mulf %42, %43 : vector<8x32xf32>
      %45 = vector.broadcast %15 : vector<1x32xf32> to vector<8x32xf32>
      %46 = arith.addf %44, %45 : vector<8x32xf32>
      %c0_22 = arith.constant 0 : index
      %c0_23 = arith.constant 0 : index
      %47 = vector.load %arg5[%c0_22, %c0_23] : memref<8x32xf32, #tpu.memory_space<vmem>>, vector<8x32xf32>
      tpu.vector_store %arg5[%c0_22, %c0_23], %46 {strides = array<i32>} : memref<8x32xf32, #tpu.memory_space<vmem>>, vector<8x32xf32>,
    } else {
    }
    return
  }
  func.func @transform_0(%arg0: i32, %arg1: i32) -> (i32, i32) {
    %c0_i32 = arith.constant 0 : i32
    return %arg0, %arg1 : i32, i32
  }
  func.func @transform_1(%arg0: i32, %arg1: i32) -> (i32, i32) {
    %c0_i32 = arith.constant 0 : i32
    %c0_i32_0 = arith.constant 0 : i32
    return %arg1, %c0_i32 : i32, i32
  }
  func.func @transform_2(%arg0: i32, %arg1: i32) -> (i32, i32) {
    %c0_i32 = arith.constant 0 : i32
    %c0_i32_0 = arith.constant 0 : i32
    %c0_i32_1 = arith.constant 0 : i32
    return %c0_i32, %c0_i32_0 : i32, i32
  }
  func.func @transform_3(%arg0: i32, %arg1: i32) -> (i32, i32) {
    %c0_i32 = arith.constant 0 : i32
    %c0_i32_0 = arith.constant 0 : i32
    return %arg0, %c0_i32 : i32, i32
  }
}

module attributes {stable_mosaic.version = 11 : i64} {
  func.func @_wubu_level_kernel(%arg0: i32, %arg1: i32, %arg2: memref<8x32xf32, #tpu.memory_space<vmem>>, %arg3: memref<32x32xf32, #tpu.memory_space<vmem>>, %arg4: memref<8x32xf32, #tpu.memory_space<vmem>>, %arg5: memref<8x32xf32, #tpu.memory_space<vmem>>, %arg6: memref<8x32xf32, #tpu.memory_space<vmem>>) attributes {dimension_semantics = [#tpu.dimension_semantics<parallel>, #tpu.dimension_semantics<arbitrary>], iteration_bounds = array<i64: 2, 1>, scalar_prefetch = 0 : i64, scratch_operands = 1 : i64, tpu.core_type = #tpu.core_type<tc>, window_params = [{transform_indices = @transform_0, window_bounds = array<i64: 8, 32>}, {transform_indices = @transform_1, window_bounds = array<i64: 32, 32>}, {pipeline_mode = #tpu.pipeline_mode<synchronous>, transform_indices = @transform_2, window_bounds = array<i64: 8, 32>}, {transform_indices = @transform_3, window_bounds = array<i64: 8, 32>}]} {
    %c0_i32 = arith.constant 0 : i32
    %0 = arith.cmpi eq, %arg1, %c0_i32 : i32
    %1 = arith.extui %0 : i1 to i32
    %c0_i32_0 = arith.constant 0 : i32
    %2 = arith.cmpi ne, %1, %c0_i32_0 : i32
    scf.if %2 {
      %cst_10 = arith.constant 0.000000e+00 : f32
      %12 = vector.broadcast %cst_10 : f32 to vector<8x32xf32>
      %c0_11 = arith.constant 0 : index
      %c0_12 = arith.constant 0 : index
      %13 = vector.load %arg6[%c0_11, %c0_12] : memref<8x32xf32, #tpu.memory_space<vmem>>, vector<8x32xf32>
      tpu.vector_store %arg6[%c0_11, %c0_12], %12 {strides = array<i32>} : memref<8x32xf32, #tpu.memory_space<vmem>>, vector<8x32xf32>,
    } else {
    }
    %c0 = arith.constant 0 : index
    %c0_1 = arith.constant 0 : index
    %3 = vector.load %arg6[%c0, %c0_1] : memref<8x32xf32, #tpu.memory_space<vmem>>, vector<8x32xf32>
    %c0_2 = arith.constant 0 : index
    %c0_3 = arith.constant 0 : index
    %4 = vector.load %arg2[%c0_2, %c0_3] : memref<8x32xf32, #tpu.memory_space<vmem>>, vector<8x32xf32>
    %c0_4 = arith.constant 0 : index
    %c0_5 = arith.constant 0 : index
    %5 = vector.load %arg3[%c0_4, %c0_5] : memref<32x32xf32, #tpu.memory_space<vmem>>, vector<32x32xf32>
    %cst = arith.constant dense<0.000000e+00> : vector<8x32xf32>
    %6 = tpu.matmul %4, %5, %cst {dimension_numbers = #tpu.dot_dimension_numbers<[1], [0], [0], [1], [0, 0, 1, 1], [], []>} : vector<8x32xf32>, vector<32x32xf32>, vector<8x32xf32> -> vector<8x32xf32>
    %7 = arith.addf %3, %6 : vector<8x32xf32>
    %c0_6 = arith.constant 0 : index
    %c0_7 = arith.constant 0 : index
    %8 = vector.load %arg6[%c0_6, %c0_7] : memref<8x32xf32, #tpu.memory_space<vmem>>, vector<8x32xf32>
    tpu.vector_store %arg6[%c0_6, %c0_7], %7 {strides = array<i32>} : memref<8x32xf32, #tpu.memory_space<vmem>>, vector<8x32xf32>,
    %c0_i32_8 = arith.constant 0 : i32
    %9 = arith.cmpi eq, %arg1, %c0_i32_8 : i32
    %10 = arith.extui %9 : i1 to i32
    %c0_i32_9 = arith.constant 0 : i32
    %11 = arith.cmpi ne, %10, %c0_i32_9 : i32
    scf.if %11 {
      %c0_10 = arith.constant 0 : index
      %c0_11 = arith.constant 0 : index
      %12 = vector.load %arg4[%c0_10, %c0_11] : memref<8x32xf32, #tpu.memory_space<vmem>>, vector<8x32xf32>
      %13 = vector.extract_strided_slice %12 {offsets = [0, 0], sizes = [1, 32], strides = [1, 1]} : vector<8x32xf32> to vector<1x32xf32>
      %14 = vector.extract_strided_slice %12 {offsets = [1, 0], sizes = [1, 32], strides = [1, 1]} : vector<8x32xf32> to vector<1x32xf32>
      %15 = vector.extract_strided_slice %12 {offsets = [2, 0], sizes = [1, 32], strides = [1, 1]} : vector<8x32xf32> to vector<1x32xf32>
      %c0_12 = arith.constant 0 : index
      %c0_13 = arith.constant 0 : index
      %16 = vector.load %arg6[%c0_12, %c0_13] : memref<8x32xf32, #tpu.memory_space<vmem>>, vector<8x32xf32>
      %17 = vector.broadcast %13 : vector<1x32xf32> to vector<8x32xf32>
      %18 = arith.addf %16, %17 : vector<8x32xf32>
      %cst_14 = arith.constant 5.000000e-01 : f32
      %19 = vector.broadcast %cst_14 : f32 to vector<8x32xf32>
      %20 = arith.mulf %19, %18 : vector<8x32xf32>
      %cst_15 = arith.constant 0.707106769 : f32
      %21 = vector.broadcast %cst_15 : f32 to vector<8x32xf32>
      %22 = arith.mulf %18, %21 : vector<8x32xf32>
      %23 = math.erf %22 : vector<8x32xf32>
      %cst_16 = arith.constant 1.000000e+00 : f32
      %24 = vector.broadcast %cst_16 : f32 to vector<8x32xf32>
      %25 = arith.addf %24, %23 : vector<8x32xf32>
      %26 = arith.mulf %20, %25 : vector<8x32xf32>
      %cst_17 = arith.constant dense<0.000000e+00> : vector<8xf32>
      %27 = vector.multi_reduction <add>, %26, %cst_17 [1] : vector<8x32xf32> to vector<8xf32>
      %28 = vector.shape_cast %27 : vector<8xf32> to vector<8x1xf32>
      %cst_18 = arith.constant 3.200000e+01 : f32
      %29 = vector.broadcast %cst_18 : f32 to vector<8x1xf32>
      %30 = arith.divf %28, %29 : vector<8x1xf32>
      %31 = vector.broadcast %30 : vector<8x1xf32> to vector<8x32xf32>
      %32 = arith.subf %26, %31 : vector<8x32xf32>
      %33 = arith.mulf %32, %32 : vector<8x32xf32>
      %cst_19 = arith.constant dense<0.000000e+00> : vector<8xf32>
      %34 = vector.multi_reduction <add>, %33, %cst_19 [1] : vector<8x32xf32> to vector<8xf32>
      %35 = vector.shape_cast %34 : vector<8xf32> to vector<8x1xf32>
      %cst_20 = arith.constant 3.200000e+01 : f32
      %36 = vector.broadcast %cst_20 : f32 to vector<8x1xf32>
      %37 = arith.divf %35, %36 : vector<8x1xf32>
      %cst_21 = arith.constant 9.99999974E-6 : f32
      %38 = vector.broadcast %cst_21 : f32 to vector<8x1xf32>
      %39 = arith.addf %37, %38 : vector<8x1xf32>
      %40 = math.rsqrt %39 : vector<8x1xf32>
      %41 = vector.broadcast %40 : vector<8x1xf32> to vector<8x32xf32>
      %42 = arith.mulf %32, %41 : vector<8x32xf32>
      %43 = vector.broadcast %14 : vector<1x32xf32> to vector<8x32xf32>
      %44 = arith.mulf %42, %43 : vector<8x32xf32>
      %45 = vector.broadcast %15 : vector<1x32xf32> to vector<8x32xf32>
      %46 = arith.addf %44, %45 : vector<8x32xf32>
      %c0_22 = arith.constant 0 : index
      %c0_23 = arith.constant 0 : index
      %47 = vector.load %arg5[%c0_22, %c0_23] : memref<8x32xf32, #tpu.memory_space<vmem>>, vector<8x32xf32>
      tpu.vector_store %arg5[%c0_22, %c0_23], %46 {strides = array<i32>} : memref<8x32xf32, #tpu.memory_space<vmem>>, vector<8x32xf32>,
    } else {
    }
    return
  }
  func.func @transform_0(%arg0: i32, %arg1: i32) -> (i32, i32) {
    %c0_i32 = arith.constant 0 : i32
    return %arg0, %arg1 : i32, i32
  }
  func.func @transform_1(%arg0: i32, %arg1: i32) -> (i32, i32) {
    %c0_i32 = arith.constant 0 : i32
    %c0_i32_0 = arith.constant 0 : i32
    return %arg1, %c0_i32 : i32, i32
  }
  func.func @transform_2(%arg0: i32, %arg1: i32) -> (i32, i32) {
    %c0_i32 = arith.constant 0 : i32
    %c0_i32_0 = arith.constant 0 : i32
    %c0_i32_1 = arith.constant 0 : i32
    return %c0_i32, %c0_i32_0 : i32, i32
  }
  func.func @transform_3(%arg0: i32, %arg1: i32) -> (i32, i32) {
    %c0_i32 = arith.constant 0 : i32
    %c0_i32_0 = arith.constant 0 : i32
    return %arg0, %c0_i32 : i32, i32
  }
}

</mosaic_0001>

<bundles_post_ra>
// kernel: tpu_custom_call.1
= control target key start
LH: loop header
LB: loop body
LE: loop exit
PB: predicated region body
PF: predicated region fallthrough
CT: control target
= control target key end

     0   :  { %8 = vsyncpa [#allocation4], 0  ;;  %s1074_s0 = inlined_call_operand.hbm [shape: f32[16,32], index: 0, kind: input, shape index: {}]   ;;  %s1075_s1 = inlined_call_operand.hbm [shape: f32[32,32], index: 1, kind: input, shape index: {}]   ;;  %s1076_s2 = inlined_call_operand.hbm [shape: f32[8,32], index: 2, kind: input, shape index: {}]   ;;  %s1077_s3 = inlined_call_operand.hbm [shape: f32[16,32], index: 3, kind: output, shape index: {}]  }
   0x1   :  { %10 = vsyncpa [#allocation4 + $0x1], 0 }
   0x2   :  { %11 = vsyncpa [#allocation7], 0 }
   0x3   :  { %12 = vsyncpa [#allocation5], 0 }
   0x4   :  { %14 = vsyncpa [#allocation5 + $0x1], 0  ;;  %s814_s12 = smov 0   ;;  %s816_s13 = smov 0  }
   0x5   :  { %s818_s14 = smov 0   ;;  %s820_s15 = smov 0  }
   0x6   :  { %s822_s16 = smov 0   ;;  %s824_s17 = smov 0  }
   0x7 LB: > { %s479_s18 = sadd.s32 4294967295, %s783_s17   ;;  %s480_s19 = sadd.s32 4294967294, %s783_s17   ;;  %s783_s17 = sphi %s824_s17, %s20_s17   ;;  %s779_s16 = sphi %s822_s16, %s1099_s16   ;;  %s775_s15 = sphi %s820_s15, %s1098_s15   ;;  %s771_s14 = sphi %s818_s14, %s1097_s14   ;;  %s767_s13 = sphi %s816_s13, %s1096_s13   ;;  %s763_s12 = sphi %s814_s12, %s1095_s12  }
   0x8   : > { %p54_p0 = scmp.ne.s32.totalorder %s767_s13, %s763_s12  ;;  %p848_p1 = scmp.eq.s32.totalorder %s479_s18, 0 }
   0x9   : > { %p852_p2 = scmp.eq.s32.totalorder %s479_s18, 1  ;;  %p131_p3 = scmp.eq.s32.totalorder %s480_s19, 1 }
   0xa   : > { %s1082_s20 = scalar_select %p848_p1, 1, 0 }
   0xb   : > { %p858_p4 = por %p848_p1, %p54_p0  ;;  %p481_p5 = scmp.ge.s32.totalorder %s783_s17, 1 }
   0xc   : > { %p863_p6 = por %p131_p3, %p54_p0  ;;  %p138_p7 = scmp.lt.s32.totalorder %s783_s17, 3 }
   0xd   : > { %s1084_s22 = scalar_select %p858_p4, 1, 0 }
   0xe   : > { %s1085_s23 = scalar_select %p863_p6, 1, 0 }
   0xf   : > { %p868_p8 = pnand %p481_p5, %p138_p7  ;;  %s785_s25 = smov [#allocation6]  }
  0x10   : > { %s153_s26 = sshll.u32 %s785_s25, 4  ;;  %s786_s28 = smov [#allocation8]   ;;  %s872_s26 = int_to_ptr.vmem [resolvable:$true] %s153_s26 }
  0x11   : > { %p531_p9 = pneg %p868_p8  ;;  %s167_s29 = sshll.u32 %s786_s28, 4  ;;  %s883_s29 = int_to_ptr.vmem [resolvable:$true] %s167_s29 }
  0x12   : > { %s611_s5 = scalar_lea.hbm %s1075_s1, 512 }
  0x13   : > { %p879_p11 = pnand %p531_p9, %p848_p1  ;;  %p612_p12 = scmp.ne.s32.totalorder %s1075_s1, %s611_s5 }
  0x14   : > { %p618_p5 = scmp.lt.u32.totalorder %s611_s5, %s1075_s1 }
  0x15   : > { %p613_p13 = pneg %p879_p11 }
  0x17   : > { %p614_p0 = pnand %p613_p13, %p612_p12 }
  0x19   : > { %p615_p3 = pneg %p614_p0 }
  0x1b   : > { %p620_p7 = pnand %p618_p5, %p615_p3 }
  0x1d   : > { %623 = shalt.err (!%p620_p7)
}
  0x1e   : > { %s624_s10 = scalar_lea.vmem %s872_s26, 512  ;;  %p632_p1 = scmp.lt.s32.totalorder %s872_s26, %s872_s26 }
  0x1f   : > { %p625_p9 = scmp.ne.s32.totalorder %s872_s26, %s624_s10  ;;  %p633_p12 = scmp.lt.s32.totalorder %s624_s10, %s624_s10 }
  0x21   : > { %p627_p10 = pnand %p625_p9, %p613_p13  ;;  %p634_p0 = por %p633_p12, %p632_p1 }
  0x23   : > { %p628_p6 = pneg %p627_p10 }
  0x25   : > { %p635_p4 = pnand %p634_p0, %p628_p6 }
  0x27   : > { %638 = shalt.err (!%p635_p4)
}
  0x28   : > { %s787_s11 = smov 128   ;;  %s788_s18 = smov 8  }
  0x29   : > { %534 = dma.hbm_to_vmem [thread:$0]  (!%p879_p11), %s1075_s1, 512, %s872_s26, [#allocation7], %s787_s11, %s787_s11, %s788_s18  }
  0x2a   : > { %s639_s4 = scalar_lea.hbm %s1076_s2, 128 }
  0x2b   : > { %p640_p1 = scmp.ne.s32.totalorder %s1076_s2, %s639_s4  ;;  %p646_p10 = scmp.lt.u32.totalorder %s639_s4, %s1076_s2 }
  0x2d   : > { %p642_p4 = pnand %p640_p1, %p613_p13 }
  0x2f   : > { %p643_p6 = pneg %p642_p4 }
  0x31   : > { %p648_p3 = pnand %p646_p10, %p643_p6 }
  0x33   : > { %651 = shalt.err (!%p648_p3)
}
  0x34   : > { %s652_s26 = scalar_lea.vmem %s883_s29, 128  ;;  %p660_p12 = scmp.lt.s32.totalorder %s883_s29, %s883_s29 }
  0x35   : > { %p653_p5 = scmp.ne.s32.totalorder %s883_s29, %s652_s26  ;;  %p661_p0 = scmp.lt.s32.totalorder %s652_s26, %s652_s26 }
  0x37   : > { %p655_p7 = pnand %p653_p5, %p613_p13  ;;  %p662_p1 = por %p661_p0, %p660_p12 }
  0x39   : > { %p656_p9 = pneg %p655_p7 }
  0x3b   : > { %p663_p4 = pnand %p662_p1, %p656_p9 }
  0x3d   : > { %666 = shalt.err (!%p663_p4)
}
  0x3e   : > { %537 = dma.hbm_to_vmem [thread:$0]  (!%p879_p11), %s1076_s2, 128, %s883_s29, [#allocation7]  }
  0x3f   : > { %s32_s11 = sadd.s32 1, %s779_s16  ;;  %s41_s18 = sadd.s32 1, %s771_s14 }
  0x40   : > { %p34_p13 = scmp.ge.s32.totalorder %s32_s11, 2  ;;  %p48_p6 = scmp.ne.s32.totalorder %s771_s14, %s767_s13 }
  0x41   : > { %p49_p10 = scmp.eq.s32.totalorder %s783_s17, 0  ;;  %p548_p3 = scmp.lt.s32.totalorder %s783_s17, 2 }
  0x42   : > { %s1101_s11 = smov (%p34_p13, %s32_s11), 0  ;;  %p947_p7 = por %p852_p2, %p48_p6 }
  0x43   : > { %p50_p5 = por %p49_p10, %p48_p6  ;;  %s36_s19 = ssub.s32 %s779_s16, %s1101_s11 }
  0x44   : > { %s1088_s27 = scalar_select %p947_p7, 1, 0 }
  0x45   : > { %s178_s25 = sand.u32 1, %s771_s14   ;;  %p39_p9 = scmp.eq.s32.totalorder %s36_s19, 0 }
  0x46   : > { %s485_s29 = sshll.u32 %s178_s25, 3  ;;  %s486_s28 = sshll.u32 %s779_s16, 7 }
  0x47   : > { %s956_s30 = scalar_select %p39_p9, %s771_s14, %s41_s18  }
  0x48   : > { %s961_s6 = scalar_lea.hbm %s1074_s0, %s486_s28  ;;  %s182_s21 = scalar_lea.vmem [#allocation3], %s485_s29 }
  0x49   : > { %s190_s7 = sshll.u32 %s182_s21, 4  ;;  %p965_p2 = pnand %p548_p3, %p50_p5  ;;  %s969_s7 = int_to_ptr.vmem [resolvable:$true] %s190_s7 }
  0x4a   : > { %s179_s26 = scalar_lea.sflag [#allocation4], %s178_s25  ;;  %s667_s9 = scalar_lea.hbm %s961_s6, 128 }
  0x4b   : > { %p668_p11 = scmp.ne.s32.totalorder %s961_s6, %s667_s9  ;;  %p669_p12 = pneg %p965_p2 }
  0x4c   : > { %s672_s19 = scalar_lea.hbm %s1074_s0, 256  ;;  %p673_p4 = scmp.lt.u32.totalorder %s961_s6, %s1074_s0 }
  0x4d   : > { %p670_p0 = pnand %p669_p12, %p668_p11  ;;  %p674_p13 = scmp.lt.u32.totalorder %s672_s19, %s667_s9 }
  0x4e   : > { %p676_p10 = scmp.lt.u32.totalorder %s667_s9, %s961_s6 }
  0x4f   : > { %p671_p1 = pneg %p670_p0  ;;  %p675_p6 = por %p674_p13, %p673_p4 }
  0x51   : > { %p677_p3 = por %p676_p10, %p675_p6 }
  0x53   : > { %p678_p5 = pnand %p677_p3, %p671_p1 }
  0x55   : > { %681 = shalt.err (!%p678_p5)
}
  0x56   : > { %s682_s25 = scalar_lea.vmem %s969_s7, 128  ;;  %s789_s4 = smov [#allocation3]  }
  0x57   : > { %p683_p9 = scmp.ne.s32.totalorder %s969_s7, %s682_s25  ;;  %s687_s5 = sshll.u32 %s789_s4, 4  ;;  %s688_s5 = int_to_ptr.vmem [resolvable:$false] %s687_s5 }
  0x58   : > { %s689_s21 = scalar_lea.vmem %s688_s5, 256  ;;  %p690_p7 = scmp.lt.s32.totalorder %s969_s7, %s688_s5 }
  0x59   : > { %p685_p11 = pnand %p683_p9, %p669_p12  ;;  %p691_p4 = scmp.lt.s32.totalorder %s689_s21, %s682_s25 }
  0x5b   : > { %p686_p0 = pneg %p685_p11  ;;  %p692_p13 = por %p691_p4, %p690_p7 }
  0x5d   : > { %p693_p6 = pnand %p692_p13, %p686_p0 }
  0x5f   : > { %696 = shalt.err (!%p693_p6)
}
  0x60   : > { %541 = dma.hbm_to_vmem [thread:$0]  (!%p965_p2), %s961_s6, 128, %s969_s7, %s179_s26  }
  0x61   : > { %199 = sbr.rel (%p868_p8) target bundleno = 687 (0x2af), region = 32  ;;  %s999_s9 = sand.u32 (!%p868_p8), 1, %s767_s13  }
  0x62   : > { %s488_s10 = sshll.u32 (!%p868_p8), %s999_s9, 3  ;;  %s202_s18 = scalar_lea.sflag (!%p868_p8), [#allocation4], %s999_s9 }
  0x63   : > { %s205_s19 = scalar_lea.vmem (!%p868_p8), [#allocation3], %s488_s10  ;;  %p1090_p7 = scmp.ne.s32.totalorder (!%p868_p8), %s1084_s22, 0 }
  0x68   : > { %750 = dma.done.wait (%p1090_p7), %s202_s18, 128  }
  0x69   : > { %752 = vsyncadd (%p1090_p7), %s202_s18, 4294967168  ;;  %p1091_p2 = scmp.ne.s32.totalorder %s1082_s20, 0 }
  0x6b   : > { %754 = dma.done.wait (%p1091_p2), [#allocation7], 640  }
  0x6c   : > { %756 = vsyncadd (%p1091_p2), [#allocation7], 4294966656  ;;  %vm241_vm0 = vcmask 261120   ;;  %v790_v0 = vmov 0.0|0.0   ;;  %v791_v1 = vmov 0.0   ;;  %vm792_vm1 = vmmov 0  }
  0x6d   : > { %513 = vmatprep.subr.bf16.mxu0 %v790_v0  ;;  %242 = vst.msk [vmem:[#allocation2] sm:$0xff] %vm241_vm0, %v791_v1  ;;  %510 = vmatprep.mubr.msk.f32.mxu0 %vm792_vm1, %v791_v1  ;;  %v245_v2 = vld [vmem:[#allocation6] sm:$0xff]  ;;  %v246_v3 = vld [vmem:[#allocation6 + $0x8] sm:$0xff]  ;;  %v247_v4 = vld [vmem:[#allocation6 + $0x10] sm:$0xff]  ;;  %v330_v9 = vlaneseq  ;;  %s494_s20 = sshll.u32 %s775_s15, 7  ;;  %s235_s22 = scalar_lea.vmem [#allocation9], %s488_s10 }
  0x6e   : > { %v514_v5 = vpack.c.bf16 %v246_v3, %v245_v2  ;;  %v248_v6 = vld [vmem:[#allocation6 + $0x18] sm:$0xff]  ;;  %v328_v13 = vld [vmem:[#allocation8] sm:$0xff]  ;;  %s379_s24 = sshll.u32 %s235_s22, 4  ;;  %s1024_s8 = scalar_lea.hbm %s1077_s3, %s494_s20  ;;  %s1026_s24 = int_to_ptr.vmem [resolvable:$true] %s379_s24 }
  0x6f   : > { %v517_v7 = vpack.c.bf16 %v248_v6, %v247_v4  ;;  %v244_v8 = vld [vmem:[%s205_s19] sm:$0xff]  ;;  %v331_v10 = vshrl.u32 %v330_v9, 7  ;;  %s366_s26 = scalar_lea.sflag [#allocation5], %s999_s9  ;;  %s697_s29 = scalar_lea.vmem %s1026_s24, 128 }
  0x70   : > { %515 = vmatpush3.bf16.msra.mxu0 %v514_v5  ;;  %p698_p8 = scmp.ne.s32.totalorder %s1026_s24, %s697_s29  ;;  %p1092_p12 = scmp.ne.s32.totalorder %s1088_s27, 0 }
  0x71   : > { %516 = vmatprep.subr.bf16.mxu0 %v790_v0  ;;  %v356_v11 = vsub.s32 1, %v331_v10  ;;  %v361_v12 = vsub.s32 2, %v331_v10  ;;  %v332_v20 = vsub.s32 0, %v331_v10  ;;  %s793_s15 = smov [#allocation9]  }
  0x72   : > { %p699_p1 = pnand %p698_p8, %p1092_p12  ;;  %s701_s28 = sshll.u32 %s793_s15, 4  ;;  %s702_s28 = int_to_ptr.vmem [resolvable:$false] %s701_s28 }
  0x73   : > { %v357_v14 = vrot.slane %v328_v13, %v356_v11  ;;  %v362_v15 = vrot.slane %v328_v13, %v361_v12  ;;  %v333_v21 = vrot.slane %v328_v13, %v332_v20  ;;  %s703_s25 = scalar_lea.vmem %s702_s28, 256  ;;  %p704_p3 = scmp.lt.s32.totalorder %s1026_s24, %s702_s28 }
  0x74   : > { %518 = vmatpush3.bf16.msra.mxu0 %v517_v7  ;;  %v243_v16 = vld [vmem:[#allocation2] sm:$0xff]  ;;  %p700_p10 = pneg %p699_p1  ;;  %p705_p5 = scmp.lt.s32.totalorder %s703_s25, %s697_s29 }
  0x76   : > { %p706_p9 = por %p705_p5, %p704_p3 }
  0x77   : > { %511 = vmatmul.mubr.msk.f32.vlgmr.msra.gmra.mrb[0].mxu0 %vm241_vm0, %v244_v8 }
  0x78   : > { %p707_p11 = pnand %p706_p9, %p700_p10 }
 0x14a   : > { %v319_v17 = vpop.f32.mrb[0].mxu0 }
 0x14b   : > { %v323_v18 = vadd.f32 %v319_v17, %v243_v16  ;;  %v512_v19 = vpop.f32.mrb[1].mxu0 }
 0x14d   : > { %324 = vst.msk [vmem:[#allocation2] sm:$0xff] %vm241_vm0, %v323_v18 }
 0x154   : > { %v329_v22 = vld [vmem:[#allocation2] sm:$0xff] }
 0x155   : > { %v334_v23 = vadd.f32 %v333_v21, %v329_v22 }
 0x157   : > { %v336_v24 = vmul.f32 0.70710677, %v334_v23  ;;  %v335_v26 = vmul.f32 0.5, %v334_v23 }
 0x159   : > { %607 = verf.f32 %v336_v24 }
 0x163   : > { %v608_v25 = vpop.eup %607 }
 0x164   : > { %v338_v27 = vadd.f32 1.0, %v608_v25 }
 0x166   : > { %v339_v28 = vmul.f32 %v338_v27, %v335_v26 }
 0x168   : > { %v340_v29 = vsel %vm241_vm0, %v339_v28, 0.0 }
 0x169   : > { %341 = vadd.xlane.f32.xlu0 %v340_v29 }
 0x1f6   : > { %v342_v30 = vpop.xlane.xlu0 %341 }
 0x1f7   : > { %v344_v31 = vmul.f32 0.03125, %v342_v30 }
 0x1f9   : > { %v345_v32 = vsub.f32 %v339_v28, %v344_v31 }
 0x1fb   : > { %v346_v33 = vmul.f32 %v345_v32, %v345_v32 }
 0x1fd   : > { %v347_v34 = vsel %vm241_vm0, %v346_v33, 0.0 }
 0x1fe   : > { %348 = vadd.xlane.f32.xlu0 %v347_v34 }
 0x28b   : > { %v349_v35 = vpop.xlane.xlu0 %348 }
 0x28c   : > { %v350_v36 = vmul.f32 0.03125, %v349_v35 }
 0x28e   : > { %v351_v37 = vadd.f32 1e-05, %v350_v36 }
 0x290   : > { %609 = vrsqrt.f32 %v351_v37 }
 0x29a   : > { %v610_v38 = vpop.eup %609 }
 0x29b   : > { %v353_v39 = vmul.f32 %v610_v38, %v345_v32 }
 0x29d   : > { %v358_v40 = vmul.f32 %v357_v14, %v353_v39 }
 0x29f   : > { %v363_v41 = vadd.f32 %v362_v15, %v358_v40 }
 0x2a1   : > { %364 = vst.msk [vmem:[%s235_s22] sm:$0xff] %vm241_vm0, %v363_v41 }
 0x2a2   : > { %710 = shalt.err (!%p707_p11)
}
 0x2a3   : > { %s711_s4 = scalar_lea.hbm %s1024_s8, 128  ;;  %s715_s9 = scalar_lea.hbm %s1077_s3, 256 }
 0x2a4   : > { %p712_p0 = scmp.ne.s32.totalorder %s1024_s8, %s711_s4  ;;  %p716_p6 = scmp.lt.u32.totalorder %s1024_s8, %s1077_s3 }
 0x2a5   : > { %p717_p7 = scmp.lt.u32.totalorder %s715_s9, %s711_s4  ;;  %p719_p8 = scmp.lt.u32.totalorder %s711_s4, %s1024_s8 }
 0x2a6   : > { %p713_p4 = pnand %p712_p0, %p1092_p12 }
 0x2a7   : > { %p718_p2 = por %p717_p7, %p716_p6 }
 0x2a8   : > { %p714_p13 = pneg %p713_p4 }
 0x2a9   : > { %p720_p1 = por %p719_p8, %p718_p2 }
 0x2ab   : > { %p721_p10 = pnand %p720_p1, %p714_p13 }
 0x2ad   : > { %724 = shalt.err (!%p721_p10)
}
 0x2ae   : > { %529 = dma.vmem_to_hbm [thread:$0]  (%p1092_p12), %s1026_s24, 128, %s1024_s8, %s366_s26  }
 0x2af PF: > { %s391_s19 = sand.u32 1, %s763_s12   ;;  %p1093_p3 = scmp.ne.s32.totalorder %s1085_s23, 0 }
 0x2b0   : > { %p1094_p5 = scmp.ge.s32.totalorder %s783_s17, 2  ;;  %s392_s20 = scalar_lea.sflag [#allocation5], %s391_s19 }
 0x2b2   : > { %p543_p9 = pnand %p1094_p5, %p1093_p3 }
 0x2b4   : > { %758 = dma.done.wait (!%p543_p9), %s392_s20, 128  }
 0x2b5   : > { %760 = vsyncadd (!%p543_p9), %s392_s20, 4294967168  ;;  %s20_s17 = sadd.s32 1, %s783_s17   ;;  %s1095_s12 = smov %s767_s13 }
 0x2b6   : > { %p17_p11 = scmp.ge.s32.totalorder %s20_s17, 4   ;;  %s1096_s13 = smov %s771_s14 }
 0x2b7   : > { %s1097_s14 = smov %s956_s30  ;;  %s1098_s15 = smov %s779_s16 }
 0x2b8   : > { %s1099_s16 = smov %s1101_s11  ;;  %19 = sbr.rel (!%p17_p11) target bundleno = 7 (0x7), region = 94 }
 0x2bf   :  { %397 = vsyncpa [#allocation4], 1 }
 0x2c0   :  { %399 = vsyncpa [#allocation4 + $0x1], 1 }
 0x2c1   :  { %400 = vsyncpa [#allocation7], 1 }
 0x2c2   :  { %401 = vsyncpa [#allocation5], 1 }
 0x2c3   :  { %403 = vsyncpa [#allocation5 + $0x1], 1 }

// kernel: tpu_custom_call.1
= control target key start
LH: loop header
LB: loop body
LE: loop exit
PB: predicated region body
PF: predicated region fallthrough
CT: control target
= control target key end

     0   :  { %8 = vsyncpa [#allocation4], 0  ;;  %s1074_s0 = inlined_call_operand.hbm [shape: f32[16,32], index: 0, kind: input, shape index: {}]   ;;  %s1075_s1 = inlined_call_operand.hbm [shape: f32[32,32], index: 1, kind: input, shape index: {}]   ;;  %s1076_s2 = inlined_call_operand.hbm [shape: f32[8,32], index: 2, kind: input, shape index: {}]   ;;  %s1077_s3 = inlined_call_operand.hbm [shape: f32[16,32], index: 3, kind: output, shape index: {}]  }
   0x1   :  { %10 = vsyncpa [#allocation4 + $0x1], 0 }
   0x2   :  { %11 = vsyncpa [#allocation7], 0 }
   0x3   :  { %12 = vsyncpa [#allocation5], 0 }
   0x4   :  { %14 = vsyncpa [#allocation5 + $0x1], 0  ;;  %s814_s12 = smov 0   ;;  %s816_s13 = smov 0  }
   0x5   :  { %s818_s14 = smov 0   ;;  %s820_s15 = smov 0  }
   0x6   :  { %s822_s16 = smov 0   ;;  %s824_s17 = smov 0  }
   0x7 LB: > { %s479_s18 = sadd.s32 4294967295, %s783_s17   ;;  %s480_s19 = sadd.s32 4294967294, %s783_s17   ;;  %s783_s17 = sphi %s824_s17, %s20_s17   ;;  %s779_s16 = sphi %s822_s16, %s1099_s16   ;;  %s775_s15 = sphi %s820_s15, %s1098_s15   ;;  %s771_s14 = sphi %s818_s14, %s1097_s14   ;;  %s767_s13 = sphi %s816_s13, %s1096_s13   ;;  %s763_s12 = sphi %s814_s12, %s1095_s12  }
   0x8   : > { %p54_p0 = scmp.ne.s32.totalorder %s767_s13, %s763_s12  ;;  %p848_p1 = scmp.eq.s32.totalorder %s479_s18, 0 }
   0x9   : > { %p852_p2 = scmp.eq.s32.totalorder %s479_s18, 1  ;;  %p131_p3 = scmp.eq.s32.totalorder %s480_s19, 1 }
   0xa   : > { %s1082_s20 = scalar_select %p848_p1, 1, 0 }
   0xb   : > { %p858_p4 = por %p848_p1, %p54_p0  ;;  %p481_p5 = scmp.ge.s32.totalorder %s783_s17, 1 }
   0xc   : > { %p863_p6 = por %p131_p3, %p54_p0  ;;  %p138_p7 = scmp.lt.s32.totalorder %s783_s17, 3 }
   0xd   : > { %s1084_s22 = scalar_select %p858_p4, 1, 0 }
   0xe   : > { %s1085_s23 = scalar_select %p863_p6, 1, 0 }
   0xf   : > { %p868_p8 = pnand %p481_p5, %p138_p7  ;;  %s785_s25 = smov [#allocation6]  }
  0x10   : > { %s153_s26 = sshll.u32 %s785_s25, 4  ;;  %s786_s28 = smov [#allocation8]   ;;  %s872_s26 = int_to_ptr.vmem [resolvable:$true] %s153_s26 }
  0x11   : > { %p531_p9 = pneg %p868_p8  ;;  %s167_s29 = sshll.u32 %s786_s28, 4  ;;  %s883_s29 = int_to_ptr.vmem [resolvable:$true] %s167_s29 }
  0x12   : > { %s611_s5 = scalar_lea.hbm %s1075_s1, 512 }
  0x13   : > { %p879_p11 = pnand %p531_p9, %p848_p1  ;;  %p612_p12 = scmp.ne.s32.totalorder %s1075_s1, %s611_s5 }
  0x14   : > { %p618_p5 = scmp.lt.u32.totalorder %s611_s5, %s1075_s1 }
  0x15   : > { %p613_p13 = pneg %p879_p11 }
  0x17   : > { %p614_p0 = pnand %p613_p13, %p612_p12 }
  0x19   : > { %p615_p3 = pneg %p614_p0 }
  0x1b   : > { %p620_p7 = pnand %p618_p5, %p615_p3 }
  0x1d   : > { %623 = shalt.err (!%p620_p7)
}
  0x1e   : > { %s624_s10 = scalar_lea.vmem %s872_s26, 512  ;;  %p632_p1 = scmp.lt.s32.totalorder %s872_s26, %s872_s26 }
  0x1f   : > { %p625_p9 = scmp.ne.s32.totalorder %s872_s26, %s624_s10  ;;  %p633_p12 = scmp.lt.s32.totalorder %s624_s10, %s624_s10 }
  0x21   : > { %p627_p10 = pnand %p625_p9, %p613_p13  ;;  %p634_p0 = por %p633_p12, %p632_p1 }
  0x23   : > { %p628_p6 = pneg %p627_p10 }
  0x25   : > { %p635_p4 = pnand %p634_p0, %p628_p6 }
  0x27   : > { %638 = shalt.err (!%p635_p4)
}
  0x28   : > { %s787_s11 = smov 128   ;;  %s788_s18 = smov 8  }
  0x29   : > { %534 = dma.hbm_to_vmem [thread:$0]  (!%p879_p11), %s1075_s1, 512, %s872_s26, [#allocation7], %s787_s11, %s787_s11, %s788_s18  }
  0x2a   : > { %s639_s4 = scalar_lea.hbm %s1076_s2, 128 }
  0x2b   : > { %p640_p1 = scmp.ne.s32.totalorder %s1076_s2, %s639_s4  ;;  %p646_p10 = scmp.lt.u32.totalorder %s639_s4, %s1076_s2 }
  0x2d   : > { %p642_p4 = pnand %p640_p1, %p613_p13 }
  0x2f   : > { %p643_p6 = pneg %p642_p4 }
  0x31   : > { %p648_p3 = pnand %p646_p10, %p643_p6 }
  0x33   : > { %651 = shalt.err (!%p648_p3)
}
  0x34   : > { %s652_s26 = scalar_lea.vmem %s883_s29, 128  ;;  %p660_p12 = scmp.lt.s32.totalorder %s883_s29, %s883_s29 }
  0x35   : > { %p653_p5 = scmp.ne.s32.totalorder %s883_s29, %s652_s26  ;;  %p661_p0 = scmp.lt.s32.totalorder %s652_s26, %s652_s26 }
  0x37   : > { %p655_p7 = pnand %p653_p5, %p613_p13  ;;  %p662_p1 = por %p661_p0, %p660_p12 }
  0x39   : > { %p656_p9 = pneg %p655_p7 }
  0x3b   : > { %p663_p4 = pnand %p662_p1, %p656_p9 }
  0x3d   : > { %666 = shalt.err (!%p663_p4)
}
  0x3e   : > { %537 = dma.hbm_to_vmem [thread:$0]  (!%p879_p11), %s1076_s2, 128, %s883_s29, [#allocation7]  }
  0x3f   : > { %s32_s11 = sadd.s32 1, %s779_s16  ;;  %s41_s18 = sadd.s32 1, %s771_s14 }
  0x40   : > { %p34_p13 = scmp.ge.s32.totalorder %s32_s11, 2  ;;  %p48_p6 = scmp.ne.s32.totalorder %s771_s14, %s767_s13 }
  0x41   : > { %p49_p10 = scmp.eq.s32.totalorder %s783_s17, 0  ;;  %p548_p3 = scmp.lt.s32.totalorder %s783_s17, 2 }
  0x42   : > { %s1101_s11 = smov (%p34_p13, %s32_s11), 0  ;;  %p947_p7 = por %p852_p2, %p48_p6 }
  0x43   : > { %p50_p5 = por %p49_p10, %p48_p6  ;;  %s36_s19 = ssub.s32 %s779_s16, %s1101_s11 }
  0x44   : > { %s1088_s27 = scalar_select %p947_p7, 1, 0 }
  0x45   : > { %s178_s25 = sand.u32 1, %s771_s14   ;;  %p39_p9 = scmp.eq.s32.totalorder %s36_s19, 0 }
  0x46   : > { %s485_s29 = sshll.u32 %s178_s25, 3  ;;  %s486_s28 = sshll.u32 %s779_s16, 7 }
  0x47   : > { %s956_s30 = scalar_select %p39_p9, %s771_s14, %s41_s18  }
  0x48   : > { %s961_s6 = scalar_lea.hbm %s1074_s0, %s486_s28  ;;  %s182_s21 = scalar_lea.vmem [#allocation3], %s485_s29 }
  0x49   : > { %s190_s7 = sshll.u32 %s182_s21, 4  ;;  %p965_p2 = pnand %p548_p3, %p50_p5  ;;  %s969_s7 = int_to_ptr.vmem [resolvable:$true] %s190_s7 }
  0x4a   : > { %s179_s26 = scalar_lea.sflag [#allocation4], %s178_s25  ;;  %s667_s9 = scalar_lea.hbm %s961_s6, 128 }
  0x4b   : > { %p668_p11 = scmp.ne.s32.totalorder %s961_s6, %s667_s9  ;;  %p669_p12 = pneg %p965_p2 }
  0x4c   : > { %s672_s19 = scalar_lea.hbm %s1074_s0, 256  ;;  %p673_p4 = scmp.lt.u32.totalorder %s961_s6, %s1074_s0 }
  0x4d   : > { %p670_p0 = pnand %p669_p12, %p668_p11  ;;  %p674_p13 = scmp.lt.u32.totalorder %s672_s19, %s667_s9 }
  0x4e   : > { %p676_p10 = scmp.lt.u32.totalorder %s667_s9, %s961_s6 }
  0x4f   : > { %p671_p1 = pneg %p670_p0  ;;  %p675_p6 = por %p674_p13, %p673_p4 }
  0x51   : > { %p677_p3 = por %p676_p10, %p675_p6 }
  0x53   : > { %p678_p5 = pnand %p677_p3, %p671_p1 }
  0x55   : > { %681 = shalt.err (!%p678_p5)
}
  0x56   : > { %s682_s25 = scalar_lea.vmem %s969_s7, 128  ;;  %s789_s4 = smov [#allocation3]  }
  0x57   : > { %p683_p9 = scmp.ne.s32.totalorder %s969_s7, %s682_s25  ;;  %s687_s5 = sshll.u32 %s789_s4, 4  ;;  %s688_s5 = int_to_ptr.vmem [resolvable:$false] %s687_s5 }
  0x58   : > { %s689_s21 = scalar_lea.vmem %s688_s5, 256  ;;  %p690_p7 = scmp.lt.s32.totalorder %s969_s7, %s688_s5 }
  0x59   : > { %p685_p11 = pnand %p683_p9, %p669_p12  ;;  %p691_p4 = scmp.lt.s32.totalorder %s689_s21, %s682_s25 }
  0x5b   : > { %p686_p0 = pneg %p685_p11  ;;  %p692_p13 = por %p691_p4, %p690_p7 }
  0x5d   : > { %p693_p6 = pnand %p692_p13, %p686_p0 }
  0x5f   : > { %696 = shalt.err (!%p693_p6)
}
  0x60   : > { %541 = dma.hbm_to_vmem [thread:$0]  (!%p965_p2), %s961_s6, 128, %s969_s7, %s179_s26  }
  0x61   : > { %199 = sbr.rel (%p868_p8) target bundleno = 687 (0x2af), region = 32  ;;  %s999_s9 = sand.u32 (!%p868_p8), 1, %s767_s13  }
  0x62   : > { %s488_s10 = sshll.u32 (!%p868_p8), %s999_s9, 3  ;;  %s202_s18 = scalar_lea.sflag (!%p868_p8), [#allocation4], %s999_s9 }
  0x63   : > { %s205_s19 = scalar_lea.vmem (!%p868_p8), [#allocation3], %s488_s10  ;;  %p1090_p7 = scmp.ne.s32.totalorder (!%p868_p8), %s1084_s22, 0 }
  0x68   : > { %750 = dma.done.wait (%p1090_p7), %s202_s18, 128  }
  0x69   : > { %752 = vsyncadd (%p1090_p7), %s202_s18, 4294967168  ;;  %p1091_p2 = scmp.ne.s32.totalorder %s1082_s20, 0 }
  0x6b   : > { %754 = dma.done.wait (%p1091_p2), [#allocation7], 640  }
  0x6c   : > { %756 = vsyncadd (%p1091_p2), [#allocation7], 4294966656  ;;  %vm241_vm0 = vcmask 261120   ;;  %v790_v0 = vmov 0.0|0.0   ;;  %v791_v1 = vmov 0.0   ;;  %vm792_vm1 = vmmov 0  }
  0x6d   : > { %513 = vmatprep.subr.bf16.mxu0 %v790_v0  ;;  %242 = vst.msk [vmem:[#allocation2] sm:$0xff] %vm241_vm0, %v791_v1  ;;  %510 = vmatprep.mubr.msk.f32.mxu0 %vm792_vm1, %v791_v1  ;;  %v245_v2 = vld [vmem:[#allocation6] sm:$0xff]  ;;  %v246_v3 = vld [vmem:[#allocation6 + $0x8] sm:$0xff]  ;;  %v247_v4 = vld [vmem:[#allocation6 + $0x10] sm:$0xff]  ;;  %v330_v9 = vlaneseq  ;;  %s494_s20 = sshll.u32 %s775_s15, 7  ;;  %s235_s22 = scalar_lea.vmem [#allocation9], %s488_s10 }
  0x6e   : > { %v514_v5 = vpack.c.bf16 %v246_v3, %v245_v2  ;;  %v248_v6 = vld [vmem:[#allocation6 + $0x18] sm:$0xff]  ;;  %v328_v13 = vld [vmem:[#allocation8] sm:$0xff]  ;;  %s379_s24 = sshll.u32 %s235_s22, 4  ;;  %s1024_s8 = scalar_lea.hbm %s1077_s3, %s494_s20  ;;  %s1026_s24 = int_to_ptr.vmem [resolvable:$true] %s379_s24 }
  0x6f   : > { %v517_v7 = vpack.c.bf16 %v248_v6, %v247_v4  ;;  %v244_v8 = vld [vmem:[%s205_s19] sm:$0xff]  ;;  %v331_v10 = vshrl.u32 %v330_v9, 7  ;;  %s366_s26 = scalar_lea.sflag [#allocation5], %s999_s9  ;;  %s697_s29 = scalar_lea.vmem %s1026_s24, 128 }
  0x70   : > { %515 = vmatpush3.bf16.msra.mxu0 %v514_v5  ;;  %p698_p8 = scmp.ne.s32.totalorder %s1026_s24, %s697_s29  ;;  %p1092_p12 = scmp.ne.s32.totalorder %s1088_s27, 0 }
  0x71   : > { %516 = vmatprep.subr.bf16.mxu0 %v790_v0  ;;  %v356_v11 = vsub.s32 1, %v331_v10  ;;  %v361_v12 = vsub.s32 2, %v331_v10  ;;  %v332_v20 = vsub.s32 0, %v331_v10  ;;  %s793_s15 = smov [#allocation9]  }
  0x72   : > { %p699_p1 = pnand %p698_p8, %p1092_p12  ;;  %s701_s28 = sshll.u32 %s793_s15, 4  ;;  %s702_s28 = int_to_ptr.vmem [resolvable:$false] %s701_s28 }
  0x73   : > { %v357_v14 = vrot.slane %v328_v13, %v356_v11  ;;  %v362_v15 = vrot.slane %v328_v13, %v361_v12  ;;  %v333_v21 = vrot.slane %v328_v13, %v332_v20  ;;  %s703_s25 = scalar_lea.vmem %s702_s28, 256  ;;  %p704_p3 = scmp.lt.s32.totalorder %s1026_s24, %s702_s28 }
  0x74   : > { %518 = vmatpush3.bf16.msra.mxu0 %v517_v7  ;;  %v243_v16 = vld [vmem:[#allocation2] sm:$0xff]  ;;  %p700_p10 = pneg %p699_p1  ;;  %p705_p5 = scmp.lt.s32.totalorder %s703_s25, %s697_s29 }
  0x76   : > { %p706_p9 = por %p705_p5, %p704_p3 }
  0x77   : > { %511 = vmatmul.mubr.msk.f32.vlgmr.msra.gmra.mrb[0].mxu0 %vm241_vm0, %v244_v8 }
  0x78   : > { %p707_p11 = pnand %p706_p9, %p700_p10 }
 0x14a   : > { %v319_v17 = vpop.f32.mrb[0].mxu0 }
 0x14b   : > { %v323_v18 = vadd.f32 %v319_v17, %v243_v16  ;;  %v512_v19 = vpop.f32.mrb[1].mxu0 }
 0x14d   : > { %324 = vst.msk [vmem:[#allocation2] sm:$0xff] %vm241_vm0, %v323_v18 }
 0x154   : > { %v329_v22 = vld [vmem:[#allocation2] sm:$0xff] }
 0x155   : > { %v334_v23 = vadd.f32 %v333_v21, %v329_v22 }
 0x157   : > { %v336_v24 = vmul.f32 0.70710677, %v334_v23  ;;  %v335_v26 = vmul.f32 0.5, %v334_v23 }
 0x159   : > { %607 = verf.f32 %v336_v24 }
 0x163   : > { %v608_v25 = vpop.eup %607 }
 0x164   : > { %v338_v27 = vadd.f32 1.0, %v608_v25 }
 0x166   : > { %v339_v28 = vmul.f32 %v338_v27, %v335_v26 }
 0x168   : > { %v340_v29 = vsel %vm241_vm0, %v339_v28, 0.0 }
 0x169   : > { %341 = vadd.xlane.f32.xlu0 %v340_v29 }
 0x1f6   : > { %v342_v30 = vpop.xlane.xlu0 %341 }
 0x1f7   : > { %v344_v31 = vmul.f32 0.03125, %v342_v30 }
 0x1f9   : > { %v345_v32 = vsub.f32 %v339_v28, %v344_v31 }
 0x1fb   : > { %v346_v33 = vmul.f32 %v345_v32, %v345_v32 }
 0x1fd   : > { %v347_v34 = vsel %vm241_vm0, %v346_v33, 0.0 }
 0x1fe   : > { %348 = vadd.xlane.f32.xlu0 %v347_v34 }
 0x28b   : > { %v349_v35 = vpop.xlane.xlu0 %348 }
 0x28c   : > { %v350_v36 = vmul.f32 0.03125, %v349_v35 }
 0x28e   : > { %v351_v37 = vadd.f32 1e-05, %v350_v36 }
 0x290   : > { %609 = vrsqrt.f32 %v351_v37 }
 0x29a   : > { %v610_v38 = vpop.eup %609 }
 0x29b   : > { %v353_v39 = vmul.f32 %v610_v38, %v345_v32 }
 0x29d   : > { %v358_v40 = vmul.f32 %v357_v14, %v353_v39 }
 0x29f   : > { %v363_v41 = vadd.f32 %v362_v15, %v358_v40 }
 0x2a1   : > { %364 = vst.msk [vmem:[%s235_s22] sm:$0xff] %vm241_vm0, %v363_v41 }
 0x2a2   : > { %710 = shalt.err (!%p707_p11)
}
 0x2a3   : > { %s711_s4 = scalar_lea.hbm %s1024_s8, 128  ;;  %s715_s9 = scalar_lea.hbm %s1077_s3, 256 }
 0x2a4   : > { %p712_p0 = scmp.ne.s32.totalorder %s1024_s8, %s711_s4  ;;  %p716_p6 = scmp.lt.u32.totalorder %s1024_s8, %s1077_s3 }
 0x2a5   : > { %p717_p7 = scmp.lt.u32.totalorder %s715_s9, %s711_s4  ;;  %p719_p8 = scmp.lt.u32.totalorder %s711_s4, %s1024_s8 }
 0x2a6   : > { %p713_p4 = pnand %p712_p0, %p1092_p12 }
 0x2a7   : > { %p718_p2 = por %p717_p7, %p716_p6 }
 0x2a8   : > { %p714_p13 = pneg %p713_p4 }
 0x2a9   : > { %p720_p1 = por %p719_p8, %p718_p2 }
 0x2ab   : > { %p721_p10 = pnand %p720_p1, %p714_p13 }
 0x2ad   : > { %724 = shalt.err (!%p721_p10)
}
 0x2ae   : > { %529 = dma.vmem_to_hbm [thread:$0]  (%p1092_p12), %s1026_s24, 128, %s1024_s8, %s366_s26  }
 0x2af PF: > { %s391_s19 = sand.u32 1, %s763_s12   ;;  %p1093_p3 = scmp.ne.s32.totalorder %s1085_s23, 0 }
 0x2b0   : > { %p1094_p5 = scmp.ge.s32.totalorder %s783_s17, 2  ;;  %s392_s20 = scalar_lea.sflag [#allocation5], %s391_s19 }
 0x2b2   : > { %p543_p9 = pnand %p1094_p5, %p1093_p3 }
 0x2b4   : > { %758 = dma.done.wait (!%p543_p9), %s392_s20, 128  }
 0x2b5   : > { %760 = vsyncadd (!%p543_p9), %s392_s20, 4294967168  ;;  %s20_s17 = sadd.s32 1, %s783_s17   ;;  %s1095_s12 = smov %s767_s13 }
 0x2b6   : > { %p17_p11 = scmp.ge.s32.totalorder %s20_s17, 4   ;;  %s1096_s13 = smov %s771_s14 }
 0x2b7   : > { %s1097_s14 = smov %s956_s30  ;;  %s1098_s15 = smov %s779_s16 }
 0x2b8   : > { %s1099_s16 = smov %s1101_s11  ;;  %19 = sbr.rel (!%p17_p11) target bundleno = 7 (0x7), region = 94 }
 0x2bf   :  { %397 = vsyncpa [#allocation4], 1 }
 0x2c0   :  { %399 = vsyncpa [#allocation4 + $0x1], 1 }
 0x2c1   :  { %400 = vsyncpa [#allocation7], 1 }
 0x2c2   :  { %401 = vsyncpa [#allocation5], 1 }
 0x2c3   :  { %403 = vsyncpa [#allocation5 + $0x1], 1 }

</bundles_post_ra>
